<compile_context>
chip_gen: v7x
topology: tpu7x:2x2x1
jax: 0.10.0
libtpu: 0.0.40
codegen_flags: <defaults>
</compile_context>

<pallas_src>
import functools

import jax
import jax.numpy as jnp
from jax.experimental import pallas as pl
from jax.experimental.pallas import tpu as pltpu


def _decoder_kernel(slots_ref, pos_ref, w1_ref, w2_ref, rows_ref,
                    recon_ref, alpha_ref, *, batch, num_slots, feat_dim, eps):
    B, K, F = batch, num_slots, feat_dim
    N, H = pos_ref.shape
    Ds = slots_ref.shape[1]

    # --- static slices of the packed parameters (zero-cost views / tiny loads) ---
    w1_s = w1_ref[0:Ds, :]                       # (Ds, H)  slot rows of Linear-1
    w1_p = w1_ref[Ds:Ds + H, :]                  # (H,  H)  positional rows of Linear-1
    b1 = rows_ref[0:1, 0:H]                      # (1, H)
    b2 = rows_ref[1:2, 0:F + 1]                  # (1, F+1)
    gamma = rows_ref[2:3, 0:F + 1]               # (1, F+1)
    beta = rows_ref[3:4, 0:F + 1]                # (1, F+1)

    # --- Linear 1, split into slot part + positional part (no (B,K,N,Ds+H) concat) ---
    s_proj = jnp.dot(slots_ref[...], w1_s, preferred_element_type=jnp.float32)      # (B*K, H)
    # Positional half (+ bias): batch-invariant, computed exactly once.
    p_proj = jnp.dot(pos_ref[...], w1_p, preferred_element_type=jnp.float32) + b1   # (N, H)

    # Broadcast-add + ReLU, then merge leading dims so Linear-2 sees B*K*N (=128) MXU rows.
    h = jnp.maximum(s_proj[:, None, :] + p_proj[None, :, :], 0.0)                   # (B*K, N, H)
    h2 = h.reshape(B * K * N, H)

    # --- Linear 2: single MXU matmul over all F+1 output columns (logit = last column) ---
    out = jnp.dot(h2, w2_ref[...], preferred_element_type=jnp.float32) + b2         # (rows, F+1)

    # --- LayerNorm over the F+1 columns (same single lane-tile as F columns) ---
    inv_fp1 = 1.0 / (F + 1)
    mu = jnp.sum(out, axis=-1, keepdims=True) * inv_fp1
    d = out - mu
    var = jnp.sum(d * d, axis=-1, keepdims=True) * inv_fp1
    out_n = d * jax.lax.rsqrt(var + eps) * gamma + beta                             # (rows, F+1)

    recon_tok = out_n[:, :F].reshape(B, K, N, F)
    logits = out_n[:, F:F + 1].reshape(B, K, N, 1)

    # --- softmax over slots (K) + alpha-weighted recombination ---
    m = jnp.max(logits, axis=1, keepdims=True)
    e = jnp.exp(logits - m)
    denom = jnp.sum(e, axis=1, keepdims=True)
    # Exact reciprocal keeps 1e-4 parity with the f32 reference; approx=True is a drop-in EUP
    # win if ~1e-3 tolerance is acceptable.
    alpha = e * pl.reciprocal(denom)                                                # (B, K, N, 1)
    recon = jnp.sum(alpha * recon_tok, axis=1)                                      # (B, N, F)

    recon_ref[...] = recon.astype(recon_ref.dtype)
    alpha_ref[...] = alpha.astype(alpha_ref.dtype)


@functools.partial(jax.jit, static_argnames=("num_tokens", "feat_dim", "hidden_dim"))
def mlp_decoder_forward(slots, params, *, num_tokens, feat_dim, hidden_dim):
    B, K, Ds = slots.shape
    N, H, F = num_tokens, hidden_dim, feat_dim

    # Fold the batch into the matmul row dimension; all of this plumbing is inside jit.
    slots2 = slots.reshape(B * K, Ds).astype(jnp.float32)
    w1 = jnp.concatenate([params["w1_s"], params["w1_p"]], axis=0)       # (Ds+H, H)
    w2 = jnp.concatenate([params["w2_f"], params["w2_l"]], axis=1)       # (H, F+1)

    # Pack the five tiny row parameters into one array -> one DMA instead of five.
    W = max(H, F + 1)
    rows = jnp.zeros((4, W), jnp.float32)
    rows = rows.at[0, :H].set(params["b1"][0])
    rows = rows.at[1, :F].set(params["b2_f"][0]).at[1, F].set(params["b2_l"])
    rows = rows.at[2, :F].set(params["ln_g_f"][0]).at[2, F].set(params["ln_g_l"])
    rows = rows.at[3, :F].set(params["ln_b_f"][0]).at[3, F].set(params["ln_b_l"])

    kernel = functools.partial(_decoder_kernel, batch=B, num_slots=K, feat_dim=F, eps=1e-5)
    vmem = functools.partial(pl.BlockSpec, memory_space=pltpu.MemorySpace.VMEM)

    # TODO(synk): when B*K*N grows past a few hundred rows, add a row-tile grid axis with
    # dimension_semantics=("parallel",) (v7x 2nd TensorCore) and tile rows once the resident
    # f32 intermediates approach the v7x 32 MiB scoped-VMEM default.
    recon, alpha = pl.pallas_call(
        kernel,
        out_shape=(
            jax.ShapeDtypeStruct((B, N, F), jnp.float32),
            jax.ShapeDtypeStruct((B, K, N, 1), jnp.float32),
        ),
        in_specs=[
            vmem(),  # slots     (B*K, Ds)
            vmem(),  # pos_emb   (N, H)
            vmem(),  # w1 full   (Ds+H, H)
            vmem(),  # w2 full   (H, F+1)
            vmem(),  # packed row params (4, max(H, F+1))
        ],
        out_specs=(vmem(), vmem()),
    )(slots2, params["pos_emb"], w1, w2, rows)

    return recon, alpha  # alpha is (B, K, N, 1), matching the PyTorch output


def reference_forward(slots, params, *, feat_dim):
    """Pure-JAX reference mirroring the PyTorch forward exactly (full concat / full W2 / full LN)."""
    B, K, Ds = slots.shape
    pos = params["pos_emb"]                      # (N, H)
    N, H = pos.shape
    F = feat_dim
    w1 = jnp.concatenate([params["w1_s"], params["w1_p"]], axis=0)          # (Ds+H, H)
    w2 = jnp.concatenate([params["w2_f"], params["w2_l"]], axis=1)          # (H, F+1)
    b2 = jnp.concatenate([params["b2_f"][0], params["b2_l"][None]])         # (F+1,)
    g = jnp.concatenate([params["ln_g_f"][0], params["ln_g_l"][None]])
    be = jnp.concatenate([params["ln_b_f"][0], params["ln_b_l"][None]])

    slots_e = jnp.broadcast_to(slots[:, :, None, :], (B, K, N, Ds))
    pos_e = jnp.broadcast_to(pos[None, None, :, :], (B, K, N, H))
    tokens = jnp.concatenate([slots_e, pos_e], axis=-1)                     # (B, K, N, Ds+H)

    h = jnp.maximum(tokens @ w1 + params["b1"][0], 0.0)
    out = h @ w2 + b2                                                       # (B, K, N, F+1)
    mu = jnp.mean(out, axis=-1, keepdims=True)
    var = jnp.mean((out - mu) ** 2, axis=-1, keepdims=True)
    out = (out - mu) / jnp.sqrt(var + 1e-5)
    out = out * g + be

    recon_tok = out[..., :F]
    alpha_logits = out[..., -1:]
    alpha = jax.nn.softmax(alpha_logits, axis=1)                            # softmax over K
    recon = jnp.sum(alpha * recon_tok, axis=1)                              # (B, N, F)
    return recon, alpha


if __name__ == "__main__":
    # Small, forward-consistent shapes: B=2, K=4 slots, slot_dim=16, N=16 tokens,
    # feat_dim=32, hidden_dim=32.
    B, K, Ds, N, F, H = 2, 4, 16, 16, 32, 32

    key = jax.random.PRNGKey(0)
    ks = jax.random.split(key, 12)
    slots = jax.random.normal(ks[0], (B, K, Ds), jnp.float32)
    params = dict(
        pos_emb=jax.random.normal(ks[1], (N, H), jnp.float32),          # nn.Parameter randn(1,N,H) (leading 1 dropped)
        w1_s=jax.random.normal(ks[2], (Ds, H), jnp.float32) * 0.1,      # Linear(slot_dim+H, H) weight, slot rows
        w1_p=jax.random.normal(ks[3], (H, H), jnp.float32) * 0.1,       # Linear(slot_dim+H, H) weight, pos rows
        b1=jax.random.normal(ks[4], (1, H), jnp.float32) * 0.01,
        w2_f=jax.random.normal(ks[5], (H, F), jnp.float32) * 0.1,       # Linear(H, F+1) weight, feature cols
        w2_l=jax.random.normal(ks[6], (H, 1), jnp.float32) * 0.1,       # Linear(H, F+1) weight, logit col
        b2_f=jax.random.normal(ks[7], (1, F), jnp.float32) * 0.01,
        b2_l=jax.random.normal(ks[8], (), jnp.float32) * 0.01,
        ln_g_f=1.0 + 0.1 * jax.random.normal(ks[9], (1, F), jnp.float32),   # LayerNorm weight (feature part)
        ln_g_l=jnp.float32(1.0),                                            # LayerNorm weight (logit entry)
        ln_b_f=0.01 * jax.random.normal(ks[10], (1, F), jnp.float32),       # LayerNorm bias (feature part)
        ln_b_l=jnp.float32(0.0),                                            # LayerNorm bias (logit entry)
    )

    recon, alpha = mlp_decoder_forward(slots, params, num_tokens=N, feat_dim=F, hidden_dim=H)
    jax.block_until_ready(recon)
    jax.block_until_ready(alpha)

    recon_ref, alpha_ref = reference_forward(slots, params, feat_dim=F)
    assert recon.shape == (B, N, F) and alpha.shape == (B, K, N, 1)
    assert jnp.allclose(recon, recon_ref, atol=1e-4, rtol=1e-4), "recon mismatch"
    assert jnp.allclose(alpha, alpha_ref, atol=1e-4, rtol=1e-4), "alpha mismatch"
    print("KERNEL_OK")
</pallas_src>

<mosaic_0001>
module attributes {stable_mosaic.version = 11 : i64} {
  func.func @_decoder_kernel(%arg0: memref<8x16xf32, #tpu.memory_space<vmem>>, %arg1: memref<16x32xf32, #tpu.memory_space<vmem>>, %arg2: memref<48x32xf32, #tpu.memory_space<vmem>>, %arg3: memref<32x33xf32, #tpu.memory_space<vmem>>, %arg4: memref<4x33xf32, #tpu.memory_space<vmem>>, %arg5: memref<2x16x32xf32, #tpu.memory_space<vmem>>, %arg6: memref<2x4x16x1xf32, #tpu.memory_space<vmem>>) attributes {dimension_semantics = [], scalar_prefetch = 0 : i64, scratch_operands = 0 : i64, tpu.core_type = #tpu.core_type<tc>} {
    %c0 = arith.constant 0 : index
    %c0_0 = arith.constant 0 : index
    %0 = vector.load %arg2[%c0, %c0_0] : memref<48x32xf32, #tpu.memory_space<vmem>>, vector<16x32xf32>
    %c16 = arith.constant 16 : index
    %c0_1 = arith.constant 0 : index
    %1 = vector.load %arg2[%c16, %c0_1] : memref<48x32xf32, #tpu.memory_space<vmem>>, vector<32x32xf32>
    %c0_2 = arith.constant 0 : index
    %c0_3 = arith.constant 0 : index
    %2 = vector.load %arg4[%c0_2, %c0_3] : memref<4x33xf32, #tpu.memory_space<vmem>>, vector<1x32xf32>
    %c1 = arith.constant 1 : index
    %c0_4 = arith.constant 0 : index
    %3 = vector.load %arg4[%c1, %c0_4] : memref<4x33xf32, #tpu.memory_space<vmem>>, vector<1x33xf32>
    %c2 = arith.constant 2 : index
    %c0_5 = arith.constant 0 : index
    %4 = vector.load %arg4[%c2, %c0_5] : memref<4x33xf32, #tpu.memory_space<vmem>>, vector<1x33xf32>
    %c3 = arith.constant 3 : index
    %c0_6 = arith.constant 0 : index
    %5 = vector.load %arg4[%c3, %c0_6] : memref<4x33xf32, #tpu.memory_space<vmem>>, vector<1x33xf32>
    %c0_7 = arith.constant 0 : index
    %c0_8 = arith.constant 0 : index
    %6 = vector.load %arg0[%c0_7, %c0_8] : memref<8x16xf32, #tpu.memory_space<vmem>>, vector<8x16xf32>
    %cst = arith.constant dense<0.000000e+00> : vector<8x32xf32>
    %7 = tpu.matmul %6, %0, %cst {dimension_numbers = #tpu.dot_dimension_numbers<[1], [0], [0], [1], [0, 0, 1, 1], [], []>} : vector<8x16xf32>, vector<16x32xf32>, vector<8x32xf32> -> vector<8x32xf32>
    %c0_9 = arith.constant 0 : index
    %c0_10 = arith.constant 0 : index
    %8 = vector.load %arg1[%c0_9, %c0_10] : memref<16x32xf32, #tpu.memory_space<vmem>>, vector<16x32xf32>
    %cst_11 = arith.constant dense<0.000000e+00> : vector<16x32xf32>
    %9 = tpu.matmul %8, %1, %cst_11 {dimension_numbers = #tpu.dot_dimension_numbers<[1], [0], [0], [1], [0, 0, 1, 1], [], []>} : vector<16x32xf32>, vector<32x32xf32>, vector<16x32xf32> -> vector<16x32xf32>
    %10 = vector.broadcast %2 : vector<1x32xf32> to vector<16x32xf32>
    %11 = arith.addf %9, %10 : vector<16x32xf32>
    %12 = vector.shape_cast %7 : vector<8x32xf32> to vector<8x1x32xf32>
    %13 = vector.shape_cast %11 : vector<16x32xf32> to vector<1x16x32xf32>
    %14 = vector.broadcast %12 : vector<8x1x32xf32> to vector<8x16x32xf32>
    %15 = vector.broadcast %13 : vector<1x16x32xf32> to vector<8x16x32xf32>
    %16 = arith.addf %14, %15 : vector<8x16x32xf32>
    %cst_12 = arith.constant 0.000000e+00 : f32
    %17 = vector.broadcast %cst_12 : f32 to vector<8x16x32xf32>
    %18 = arith.maximumf %16, %17 : vector<8x16x32xf32>
    %19 = vector.shape_cast %18 : vector<8x16x32xf32> to vector<128x32xf32>
    %c0_13 = arith.constant 0 : index
    %c0_14 = arith.constant 0 : index
    %20 = vector.load %arg3[%c0_13, %c0_14] : memref<32x33xf32, #tpu.memory_space<vmem>>, vector<32x33xf32>
    %cst_15 = arith.constant dense<0.000000e+00> : vector<128x33xf32>
    %21 = tpu.matmul %19, %20, %cst_15 {dimension_numbers = #tpu.dot_dimension_numbers<[1], [0], [0], [1], [0, 0, 1, 1], [], []>} : vector<128x32xf32>, vector<32x33xf32>, vector<128x33xf32> -> vector<128x33xf32>
    %22 = vector.broadcast %3 : vector<1x33xf32> to vector<128x33xf32>
    %23 = arith.addf %21, %22 : vector<128x33xf32>
    %cst_16 = arith.constant dense<0.000000e+00> : vector<128xf32>
    %24 = vector.multi_reduction <add>, %23, %cst_16 [1] : vector<128x33xf32> to vector<128xf32>
    %25 = vector.shape_cast %24 : vector<128xf32> to vector<128x1xf32>
    %cst_17 = arith.constant 0.0303030312 : f32
    %26 = vector.broadcast %cst_17 : f32 to vector<128x1xf32>
    %27 = arith.mulf %25, %26 : vector<128x1xf32>
    %28 = vector.broadcast %27 : vector<128x1xf32> to vector<128x33xf32>
    %29 = arith.subf %23, %28 : vector<128x33xf32>
    %30 = arith.mulf %29, %29 : vector<128x33xf32>
    %cst_18 = arith.constant dense<0.000000e+00> : vector<128xf32>
    %31 = vector.multi_reduction <add>, %30, %cst_18 [1] : vector<128x33xf32> to vector<128xf32>
    %32 = vector.shape_cast %31 : vector<128xf32> to vector<128x1xf32>
    %cst_19 = arith.constant 0.0303030312 : f32
    %33 = vector.broadcast %cst_19 : f32 to vector<128x1xf32>
    %34 = arith.mulf %32, %33 : vector<128x1xf32>
    %cst_20 = arith.constant 9.99999974E-6 : f32
    %35 = vector.broadcast %cst_20 : f32 to vector<128x1xf32>
    %36 = arith.addf %34, %35 : vector<128x1xf32>
    %37 = math.rsqrt %36 : vector<128x1xf32>
    %38 = vector.broadcast %37 : vector<128x1xf32> to vector<128x33xf32>
    %39 = arith.mulf %29, %38 : vector<128x33xf32>
    %40 = vector.broadcast %4 : vector<1x33xf32> to vector<128x33xf32>
    %41 = arith.mulf %39, %40 : vector<128x33xf32>
    %42 = vector.broadcast %5 : vector<1x33xf32> to vector<128x33xf32>
    %43 = arith.addf %41, %42 : vector<128x33xf32>
    %44 = vector.extract_strided_slice %43 {offsets = [0, 0], sizes = [128, 32], strides = [1, 1]} : vector<128x33xf32> to vector<128x32xf32>
    %45 = vector.shape_cast %44 : vector<128x32xf32> to vector<2x4x16x32xf32>
    %46 = vector.extract_strided_slice %43 {offsets = [0, 32], sizes = [128, 1], strides = [1, 1]} : vector<128x33xf32> to vector<128x1xf32>
    %47 = vector.shape_cast %46 : vector<128x1xf32> to vector<2x4x16x1xf32>
    %cst_21 = arith.constant dense<0xFF800000> : vector<2x16x1xf32>
    %48 = vector.multi_reduction <maximumf>, %47, %cst_21 [1] : vector<2x4x16x1xf32> to vector<2x16x1xf32>
    %49 = vector.shape_cast %48 : vector<2x16x1xf32> to vector<2x1x16x1xf32>
    %50 = vector.broadcast %49 : vector<2x1x16x1xf32> to vector<2x4x16x1xf32>
    %51 = arith.subf %47, %50 : vector<2x4x16x1xf32>
    %52 = math.exp %51 : vector<2x4x16x1xf32>
    %cst_22 = arith.constant dense<0.000000e+00> : vector<2x16x1xf32>
    %53 = vector.multi_reduction <add>, %52, %cst_22 [1] : vector<2x4x16x1xf32> to vector<2x16x1xf32>
    %54 = vector.shape_cast %53 : vector<2x16x1xf32> to vector<2x1x16x1xf32>
    %55 = tpu.reciprocal %54 : vector<2x1x16x1xf32> -> vector<2x1x16x1xf32>
    %56 = vector.broadcast %55 : vector<2x1x16x1xf32> to vector<2x4x16x1xf32>
    %57 = arith.mulf %52, %56 : vector<2x4x16x1xf32>
    %58 = vector.broadcast %57 : vector<2x4x16x1xf32> to vector<2x4x16x32xf32>
    %59 = arith.mulf %58, %45 : vector<2x4x16x32xf32>
    %cst_23 = arith.constant dense<0.000000e+00> : vector<2x16x32xf32>
    %60 = vector.multi_reduction <add>, %59, %cst_23 [1] : vector<2x4x16x32xf32> to vector<2x16x32xf32>
    %c0_24 = arith.constant 0 : index
    %c0_25 = arith.constant 0 : index
    %c0_26 = arith.constant 0 : index
    %61 = vector.load %arg5[%c0_24, %c0_25, %c0_26] : memref<2x16x32xf32, #tpu.memory_space<vmem>>, vector<2x16x32xf32>
    tpu.vector_store %arg5[%c0_24, %c0_25, %c0_26], %60 {strides = array<i32>} : memref<2x16x32xf32, #tpu.memory_space<vmem>>, vector<2x16x32xf32>,
    %c0_27 = arith.constant 0 : index
    %c0_28 = arith.constant 0 : index
    %c0_29 = arith.constant 0 : index
    %c0_30 = arith.constant 0 : index
    %62 = vector.load %arg6[%c0_27, %c0_28, %c0_29, %c0_30] : memref<2x4x16x1xf32, #tpu.memory_space<vmem>>, vector<2x4x16x1xf32>
    tpu.vector_store %arg6[%c0_27, %c0_28, %c0_29, %c0_30], %57 {strides = array<i32>} : memref<2x4x16x1xf32, #tpu.memory_space<vmem>>, vector<2x4x16x1xf32>,
    return
  }
}

</mosaic_0001>

<bundles_post_ra>
// kernel: mlp_decoder_forward.1
= control target key start
LH: loop header
LB: loop body
LE: loop exit
PB: predicated region body
PF: predicated region fallthrough
CT: control target
= control target key end

     0   :  { %v1338_v3 = vmov 0.0|0.0   ;;  %vm1339_vm0 = vmmov 0   ;;  %v1340_v6 = vmov 0.0   ;;  %vm114_vm1 = vcmask 261120   ;;  %s1906_s0 = inlined_call_operand.vmem [shape: f32[8,16], index: 0, kind: input, shape index: {}]   ;;  %s1907_s1 = inlined_call_operand.vmem [shape: f32[16,32], index: 1, kind: input, shape index: {}]   ;;  %s1908_s2 = inlined_call_operand.vmem [shape: f32[48,32], index: 2, kind: input, shape index: {}]   ;;  %s1909_s3 = inlined_call_operand.vmem [shape: f32[32,33], index: 3, kind: input, shape index: {}]   ;;  %s1910_s4 = inlined_call_operand.vmem [shape: f32[4,33], index: 4, kind: input, shape index: {}]   ;;  %s1911_s5 = inlined_call_operand.hbm [shape: f32[2,16,32], index: 5, kind: output, shape index: {0}]   ;;  %s1912_s6 = inlined_call_operand.vmem [shape: f32[2,4,16,1], index: 6, kind: output, shape index: {1}]  }
   0x1   :  { %v23_v0 = vld [vmem:[%s1908_s2] sm:$0xff]  ;;  %v24_v1 = vld [vmem:[%s1908_s2 + $0x8] sm:$0xff]  ;;  %v25_v2 = vld [vmem:[%s1908_s2 + $0x10] sm:$0xff]  ;;  %1208 = vmatprep.subr.bf16.mxu0 %v1338_v3  ;;  %1162 = vmatprep.mubr.msk.f32.mxu0 %vm1339_vm0, %v1340_v6  ;;  %vm34_vm2 = vcmask 130048  }
   0x2   :  { %v1209_v4 = vpack.c.bf16 %v24_v1, %v23_v0  ;;  %v26_v5 = vld [vmem:[%s1908_s2 + $0x18] sm:$0xff]  ;;  %v27_v7 = vld [vmem:[%s1908_s2 + $0x20] sm:$0xff]  ;;  %v28_v9 = vld [vmem:[%s1908_s2 + $0x28] sm:$0xff] }
   0x3   :  { %v1211_v8 = vpack.c.bf16 %v26_v5, %v25_v2  ;;  %v108_v10 = vld [vmem:[%s1907_s1] sm:$0xff]  ;;  %v1215_v12 = vpack.c.bf16 %v28_v9, %v27_v7 }
   0x4   :  { %1210 = vmatpush3.bf16.msra.mxu0 %v1209_v4  ;;  %v33_v11 = vld [vmem:[%s1906_s0] sm:$0xff]  ;;  %1173 = vmatprep.mubr.msk.f32.mxu1 %vm114_vm1, %v108_v10 }
   0x5   :  { %12 = vsyncpa [#allocation3], 0  ;;  %1212 = vmatprep.subr.bf16.mxu1 %v1211_v8  ;;  %v109_v13 = vld [vmem:[%s1907_s1 + $0x8] sm:$0xff]  ;;  %v318_v14 = vld [vmem:[%s1909_s3] sm:$0xff]  ;;  %v1341_v20 = vmov 1966171168   ;;  %v201_v22 = vlaneseq }
   0x6   :  { %1214 = vmatpush3.bf16.msra.mxu1 %v1211_v8  ;;  %v319_v15 = vld [vmem:[%s1909_s3 + $0x8] sm:$0xff]  ;;  %v320_v17 = vld [vmem:[%s1909_s3 + $0x10] sm:$0xff]  ;;  %v321_v18 = vld [vmem:[%s1909_s3 + $0x18] sm:$0xff]  ;;  %v199_v21 = vunpack.c.l.s4 %v1341_v20  ;;  %vm519_vm3 = vcmask 269312   ;;  %vm768_vm4 = vcmask 269568   ;;  %vm1069_vm5 = vcmask 7168  }
   0x7   :  { %1163 = vmatmul.mubr.msk.f32.vlgmr.msra.gmra.mrb[0].mxu0 %vm34_vm2, %v33_v11  ;;  %1216 = vmatprep.subr.bf16.mxu1 %v1215_v12  ;;  %v1219_v16 = vpack.c.bf16 %v319_v15, %v318_v14  ;;  %v1223_v19 = vpack.c.bf16 %v321_v18, %v320_v17  ;;  %v202_v24 = vshrl.u32 %v201_v22, 7  ;;  %v1107_v38 = vld [vmem:[%s1910_s4] ss:$0 sm:$0xff]  ;;  %s1344_s23 = smov [#allocation2]  }
   0x8   :  { %v200_v23 = vunpack.c.0.s8 %v199_v21  ;;  %s1091_s24 = sshll.u32 %s1344_s23, 4  ;;  %s1092_s24 = int_to_ptr.vmem [resolvable:$true] %s1091_s24 }
   0x9   :  { %1220 = vmatprep.subr.bf16.mxu0 %v1219_v16  ;;  %v248_v30 = vsub.s32 0, %v202_v24  ;;  %p1319_p1 = scmp.lt.s32.totalorder %s1092_s24, %s1092_s24 }
   0xa   :  { %1218 = vmatpush3.bf16.msra.mxu1 %v1215_v12  ;;  %1222 = vmatpush3.bf16.msra.mxu0 %v1219_v16  ;;  %v203_v25 = vsub.s32 %v200_v23, %v202_v24  ;;  %v1110_v23 = vld [vmem:[%s1910_s4 + $0x1] ss:$0 sm:$0xff] }
   0xb   :  { %1227 = vmatprep.subr.bf16.mxu1 %v1219_v16  ;;  %1224 = vmatprep.subr.bf16.mxu0 %v1223_v19 }
   0xd   :  { %1174 = vmatmul.mubr.msk.f32.vlgmr.msra.gmra.mrb[0].mxu1 %vm114_vm1, %v109_v13 }
   0xe   :  { %1229 = vmatpush3.bf16.msra.mxu1 %v1219_v16  ;;  %1226 = vmatpush3.bf16.msra.mxu0 %v1223_v19 }
   0xf   :  { %1228 = vmatprep.subr.bf16.mxu1 %v1223_v19 }
  0x12   :  { %1230 = vmatpush3.bf16.msra.mxu1 %v1223_v19 }
  0xda   :  { %v104_v26 = vpop.f32.mrb[0].mxu0 }
  0xdb   :  { %v197_v27 = vcombine.high %v104_v26, %v104_v26  ;;  %v204_v28 = vrot.slane %v104_v26, %v203_v25  ;;  %v1164_v29 = vpop.f32.mrb[1].mxu0 }
  0xdd   :  { %v211_v31 = vrot.slane %v197_v27, %v203_v25  ;;  %v212_v32 = vcombine.high %v204_v28, %v204_v28  ;;  %v220_v33 = vrot.slane %v204_v28, %v203_v25 }
  0xdf   :  { %v213_v34 = vcombine.high %v211_v31, %v211_v31  ;;  %v227_v35 = vrot.slane %v211_v31, %v203_v25  ;;  %v234_v36 = vrot.slane %v212_v32, %v203_v25  ;;  %v242_v37 = vcombine.high %v220_v33, %v220_v33 }
  0xe0   :  { %v249_v39 = vrot.slane %v220_v33, %v248_v30  ;;  %v1175_v40 = vpop.f32.mrb[0].mxu1 }
  0xe1   :  { %v241_v41 = vrot.slane %v213_v34, %v203_v25  ;;  %v243_v42 = vcombine.high %v227_v35, %v227_v35  ;;  %v244_v43 = vcombine.high %v234_v36, %v234_v36  ;;  %v253_v44 = vrot.slane %v234_v36, %v248_v30  ;;  %v187_v45 = vpop.f32.mrb[1].mxu1 }
  0xe2   :  { %v257_v46 = vrot.slane %v242_v37, %v248_v30  ;;  %v265_v47 = vrot.slane %v227_v35, %v248_v30  ;;  %v193_v48 = vadd.f32 %v1175_v40, %v1107_v38  ;;  %v188_v49 = vadd.f32 %v1107_v38, %v187_v45 }
  0xe3   :  { %v245_v50 = vcombine.high %v241_v41, %v241_v41  ;;  %v261_v51 = vrot.slane %v244_v43, %v248_v30  ;;  %v269_v52 = vrot.slane %v241_v41, %v248_v30  ;;  %v273_v53 = vrot.slane %v243_v42, %v248_v30 }
  0xe4   :  { %v286_v54 = vadd.f32 %v249_v39, %v188_v49  ;;  %v287_v55 = vadd.f32 %v249_v39, %v193_v48  ;;  %v288_v56 = vadd.f32 %v253_v44, %v188_v49  ;;  %v289_v57 = vadd.f32 %v253_v44, %v193_v48 }
  0xe5   :  { %v296_v58 = vadd.f32 %v269_v52, %v188_v49  ;;  %v297_v59 = vadd.f32 %v269_v52, %v193_v48  ;;  %v298_v60 = vadd.f32 %v273_v53, %v188_v49  ;;  %v290_v61 = vadd.f32 %v257_v46, %v188_v49 }
  0xe6   :  { %v302_v62 = vmax.f32 %v286_v54, 0.0  ;;  %v303_v63 = vmax.f32 %v287_v55, 0.0  ;;  %v304_v0 = vmax.f32 %v288_v56, 0.0  ;;  %v299_v3 = vadd.f32 %v273_v53, %v193_v48 }
  0xe7   :  { %v312_v1 = vmax.f32 %v296_v58, 0.0  ;;  %v313_v2 = vmax.f32 %v297_v59, 0.0  ;;  %v277_v4 = vrot.slane %v245_v50, %v248_v30  ;;  %v291_v5 = vadd.f32 %v257_v46, %v193_v48 }
  0xe8   :  { %1184 = vmatprep.mubr.msk.f32.mxu0 %vm114_vm1, %v302_v62  ;;  %v292_v6 = vadd.f32 %v261_v51, %v188_v49  ;;  %v314_v7 = vmax.f32 %v298_v60, 0.0  ;;  %v293_v8 = vadd.f32 %v261_v51, %v193_v48  ;;  %v294_v9 = vadd.f32 %v265_v47, %v188_v49 }
  0xe9   :  { %1185 = vmatmul.mubr.msk.f32.vlgmr.msra.gmra.mrb[2].mxu0 %vm114_vm1, %v303_v63  ;;  %1199 = vmatprep.mubr.msk.f32.mxu1 %vm114_vm1, %v312_v1  ;;  %v295_v10 = vadd.f32 %v265_v47, %v193_v48  ;;  %v300_v11 = vadd.f32 %v277_v4, %v188_v49  ;;  %v305_v12 = vmax.f32 %v289_v57, 0.0  ;;  %v301_v13 = vadd.f32 %v277_v4, %v193_v48 }
  0xea   :  { %1187 = vmatprep.mubr.msk.f32.mxu0 %vm114_vm1, %v304_v0  ;;  %1200 = vmatmul.mubr.msk.f32.vlgmr.msra.gmra.mrb[2].mxu1 %vm114_vm1, %v313_v2  ;;  %v306_v14 = vmax.f32 %v290_v61, 0.0  ;;  %v315_v15 = vmax.f32 %v299_v3, 0.0  ;;  %v307_v17 = vmax.f32 %v291_v5, 0.0  ;;  %v308_v18 = vmax.f32 %v292_v6, 0.0 }
  0xeb   :  { %1202 = vmatprep.mubr.msk.f32.mxu1 %vm114_vm1, %v314_v7  ;;  %v316_v16 = vmax.f32 %v300_v11, 0.0  ;;  %v317_v19 = vmax.f32 %v301_v13, 0.0  ;;  %v309_v20 = vmax.f32 %v293_v8, 0.0  ;;  %v310_v21 = vmax.f32 %v294_v9, 0.0 }
  0xec   :  { %v311_v22 = vmax.f32 %v295_v10, 0.0 }
  0xed   :  { %1188 = vmatmul.mubr.msk.f32.gmra.mrb[4].mxu0 %vm114_vm1, %v305_v12 }
  0xee   :  { %1190 = vmatprep.mubr.msk.f32.mxu0 %vm114_vm1, %v306_v14  ;;  %1203 = vmatmul.mubr.msk.f32.gmra.mrb[4].mxu1 %vm114_vm1, %v315_v15 }
  0xef   :  { %1205 = vmatprep.mubr.msk.f32.mxu1 %vm114_vm1, %v316_v16 }
  0xf1   :  { %1191 = vmatmul.mubr.msk.f32.gmra.mrb[6].mxu0 %vm114_vm1, %v307_v17 }
  0xf2   :  { %1193 = vmatprep.mubr.msk.f32.mxu0 %vm114_vm1, %v308_v18  ;;  %1206 = vmatmul.mubr.msk.f32.gmra.mrb[6].mxu1 %vm114_vm1, %v317_v19 }
  0xf5   :  { %1194 = vmatmul.mubr.msk.f32.gmra.mrb[8].mxu0 %vm114_vm1, %v309_v20 }
  0xf6   :  { %1196 = vmatprep.mubr.msk.f32.mxu0 %vm114_vm1, %v310_v21 }
  0xf9   :  { %1197 = vmatmul.mubr.msk.f32.gmra.mrb[10].mxu0 %vm114_vm1, %v311_v22 }
 0x1bc   :  { %v1186_v24 = vpop.f32.mrb[2].mxu0 }
 0x1bd   :  { %v1445_v25 = vadd.f32 %v1186_v24, %v1110_v23  ;;  %v440_v26 = vpop.f32.mrb[3].mxu0  ;;  %v1201_v27 = vpop.f32.mrb[2].mxu1 }
 0x1be   :  { %v1447_v28 = vadd.f32 %v1201_v27, %v1110_v23  ;;  %v490_v29 = vpop.f32.mrb[3].mxu1  ;;  %v1449_v30 = vadd.f32 %v1110_v23, %v440_v26 }
 0x1bf   :  { %v523_v31 = vsel %vm519_vm3, %v1445_v25, 0.0  ;;  %v1457_v38 = vadd.f32 %v1110_v23, %v490_v29 }
 0x1c0   :  { %524 = vadd.xlane.f32.xlu0 %v523_v31  ;;  %v1189_v32 = vpop.f32.mrb[4].mxu0  ;;  %v553_v33 = vsel %vm519_vm3, %v1447_v28, 0.0  ;;  %v520_v39 = vsel %vm519_vm3, %v1449_v30, 0.0 }
 0x1c1   :  { %v1455_v34 = vadd.f32 %v1189_v32, %v1110_v23  ;;  %v450_v35 = vpop.f32.mrb[5].mxu0  ;;  %554 = vadd.xlane.f32.xlu1 %v553_v33  ;;  %v1204_v36 = vpop.f32.mrb[4].mxu1  ;;  %v550_v47 = vsel %vm519_vm3, %v1457_v38, 0.0 }
 0x1c2   :  { %v500_v37 = vpop.f32.mrb[5].mxu1  ;;  %v1461_v40 = vadd.f32 %v1110_v23, %v450_v35  ;;  %v1469_v48 = vadd.f32 %v1204_v36, %v1110_v23 }
 0x1c3   :  { %v529_v42 = vsel %vm519_vm3, %v1455_v34, 0.0  ;;  %v1465_v46 = vadd.f32 %v1110_v23, %v500_v37 }
 0x1c4   :  { %v1192_v41 = vpop.f32.mrb[6].mxu0  ;;  %521 = vadd.xlane.f32.xlu0 %v520_v39  ;;  %v526_v50 = vsel %vm519_vm3, %v1461_v40, 0.0  ;;  %v559_v56 = vsel %vm519_vm3, %v1469_v48, 0.0 }
 0x1c5   :  { %v460_v43 = vpop.f32.mrb[7].mxu0  ;;  %v1207_v44 = vpop.f32.mrb[6].mxu1  ;;  %530 = vadd.xlane.f32.xlu1 %v529_v42  ;;  %v556_v53 = vsel %vm519_vm3, %v1465_v46, 0.0  ;;  %v1477_v54 = vadd.f32 %v1192_v41, %v1110_v23 }
 0x1c6   :  { %v510_v45 = vpop.f32.mrb[7].mxu1  ;;  %v1473_v52 = vadd.f32 %v1110_v23, %v460_v43  ;;  %v1501_v4 = vadd.f32 %v1207_v44, %v1110_v23 }
 0x1c7   :  { %v535_v61 = vsel %vm519_vm3, %v1477_v54, 0.0  ;;  %v1497_v2 = vadd.f32 %v1110_v23, %v510_v45 }
 0x1c8   :  { %v1195_v49 = vpop.f32.mrb[8].mxu0  ;;  %551 = vadd.xlane.f32.xlu0 %v550_v47  ;;  %v532_v59 = vsel %vm519_vm3, %v1473_v52, 0.0  ;;  %v565_v7 = vsel %vm519_vm3, %v1501_v4, 0.0 }
 0x1c9   :  { %v470_v51 = vpop.f32.mrb[9].mxu0  ;;  %527 = vadd.xlane.f32.xlu1 %v526_v50  ;;  %v1485_v60 = vadd.f32 %v1195_v49, %v1110_v23  ;;  %v562_v6 = vsel %vm519_vm3, %v1497_v2, 0.0 }
 0x1ca   :  { %v1481_v58 = vadd.f32 %v1110_v23, %v470_v51 }
 0x1cb   :  { %v541_v1 = vsel %vm519_vm3, %v1485_v60, 0.0 }
 0x1cc   :  { %v1198_v55 = vpop.f32.mrb[10].mxu0  ;;  %557 = vadd.xlane.f32.xlu0 %v556_v53  ;;  %v538_v63 = vsel %vm519_vm3, %v1481_v58, 0.0 }
 0x1cd   :  { %v480_v57 = vpop.f32.mrb[11].mxu0  ;;  %560 = vadd.xlane.f32.xlu1 %v559_v56  ;;  %v1493_v0 = vadd.f32 %v1198_v55, %v1110_v23 }
 0x1ce   :  { %v1489_v62 = vadd.f32 %v1110_v23, %v480_v57 }
 0x1cf   :  { %v547_v5 = vsel %vm519_vm3, %v1493_v0, 0.0 }
 0x1d0   :  { %533 = vadd.xlane.f32.xlu0 %v532_v59  ;;  %v544_v3 = vsel %vm519_vm3, %v1489_v62, 0.0 }
 0x1d1   :  { %536 = vadd.xlane.f32.xlu1 %v535_v61 }
 0x1d4   :  { %539 = vadd.xlane.f32.xlu0 %v538_v63 }
 0x1d5   :  { %542 = vadd.xlane.f32.xlu1 %v541_v1 }
 0x1d8   :  { %545 = vadd.xlane.f32.xlu0 %v544_v3 }
 0x1d9   :  { %548 = vadd.xlane.f32.xlu1 %v547_v5 }
 0x1dc   :  { %563 = vadd.xlane.f32.xlu0 %v562_v6 }
 0x1dd   :  { %566 = vadd.xlane.f32.xlu1 %v565_v7 }
 0x24d   :  { %v525_v8 = vpop.xlane.xlu0 %524 }
 0x24e   :  { %v569_v9 = vmul.f32 0.030303031, %v525_v8  ;;  %v555_v10 = vpop.xlane.xlu1 %554 }
 0x24f   :  { %v579_v11 = vmul.f32 0.030303031, %v555_v10 }
 0x250   :  { %v1510_v12 = vsub.f32 %v1445_v25, %v569_v9 }
 0x251   :  { %v1513_v13 = vsub.f32 %v1447_v28, %v579_v11  ;;  %v522_v14 = vpop.xlane.xlu0 %521 }
 0x252   :  { %v568_v15 = vmul.f32 0.030303031, %v522_v14  ;;  %v531_v16 = vpop.xlane.xlu1 %530  ;;  %v601_v17 = vmul.f32 %v1510_v12, %v1510_v12 }
 0x253   :  { %v571_v18 = vmul.f32 0.030303031, %v531_v16  ;;  %v611_v21 = vmul.f32 %v1513_v13, %v1513_v13 }
 0x254   :  { %v1518_v19 = vsub.f32 %v1449_v30, %v568_v15  ;;  %v619_v20 = vsel %vm519_vm3, %v601_v17, 0.0 }
 0x255   :  { %v1524_v22 = vsub.f32 %v1455_v34, %v571_v18  ;;  %620 = vadd.xlane.f32.xlu1 %v619_v20  ;;  %v552_v23 = vpop.xlane.xlu0 %551  ;;  %v649_v29 = vsel %vm519_vm3, %v611_v21, 0.0 }
 0x256   :  { %v578_v24 = vmul.f32 0.030303031, %v552_v23  ;;  %v528_v25 = vpop.xlane.xlu1 %527  ;;  %v600_v26 = vmul.f32 %v1518_v19, %v1518_v19 }
 0x257   :  { %v570_v27 = vmul.f32 0.030303031, %v528_v25  ;;  %v603_v31 = vmul.f32 %v1524_v22, %v1524_v22 }
 0x258   :  { %v1529_v28 = vsub.f32 %v1457_v38, %v578_v24  ;;  %v616_v30 = vsel %vm519_vm3, %v600_v26, 0.0 }
 0x259   :  { %v1536_v32 = vsub.f32 %v1461_v40, %v570_v27  ;;  %650 = vadd.xlane.f32.xlu1 %v649_v29  ;;  %617 = vadd.xlane.f32.xlu0 %v616_v30  ;;  %v558_v33 = vpop.xlane.xlu0 %557  ;;  %v625_v39 = vsel %vm519_vm3, %v603_v31, 0.0 }
 0x25a   :  { %v580_v34 = vmul.f32 0.030303031, %v558_v33  ;;  %v561_v35 = vpop.xlane.xlu1 %560  ;;  %v610_v36 = vmul.f32 %v1529_v28, %v1529_v28 }
 0x25b   :  { %v581_v37 = vmul.f32 0.030303031, %v561_v35  ;;  %v602_v40 = vmul.f32 %v1536_v32, %v1536_v32 }
 0x25c   :  { %v1541_v38 = vsub.f32 %v1465_v46, %v580_v34  ;;  %v646_v41 = vsel %vm519_vm3, %v610_v36, 0.0 }
 0x25d   :  { %v1548_v42 = vsub.f32 %v1469_v48, %v581_v37  ;;  %626 = vadd.xlane.f32.xlu1 %v625_v39  ;;  %647 = vadd.xlane.f32.xlu0 %v646_v41  ;;  %v534_v43 = vpop.xlane.xlu0 %533  ;;  %v622_v50 = vsel %vm519_vm3, %v602_v40, 0.0 }
 0x25e   :  { %v572_v44 = vmul.f32 0.030303031, %v534_v43  ;;  %v537_v45 = vpop.xlane.xlu1 %536  ;;  %v612_v51 = vmul.f32 %v1541_v38, %v1541_v38 }
 0x25f   :  { %v573_v47 = vmul.f32 0.030303031, %v537_v45  ;;  %v613_v46 = vmul.f32 %v1548_v42, %v1548_v42 }
 0x260   :  { %v1553_v49 = vsub.f32 %v1473_v52, %v572_v44  ;;  %v652_v63 = vsel %vm519_vm3, %v612_v51, 0.0 }
 0x261   :  { %v1559_v48 = vsub.f32 %v1477_v54, %v573_v47  ;;  %623 = vadd.xlane.f32.xlu0 %v622_v50  ;;  %v540_v53 = vpop.xlane.xlu0 %539  ;;  %v655_v55 = vsel %vm519_vm3, %v613_v46, 0.0 }
 0x262   :  { %v574_v56 = vmul.f32 0.030303031, %v540_v53  ;;  %656 = vadd.xlane.f32.xlu1 %v655_v55  ;;  %v543_v57 = vpop.xlane.xlu1 %542  ;;  %v604_v54 = vmul.f32 %v1553_v49, %v1553_v49 }
 0x263   :  { %v575_v59 = vmul.f32 0.030303031, %v543_v57  ;;  %v605_v52 = vmul.f32 %v1559_v48, %v1559_v48 }
 0x264   :  { %v1565_v61 = vsub.f32 %v1481_v58, %v574_v56  ;;  %v628_v10 = vsel %vm519_vm3, %v604_v54, 0.0 }
 0x265   :  { %v1571_v1 = vsub.f32 %v1485_v60, %v575_v59  ;;  %653 = vadd.xlane.f32.xlu0 %v652_v63  ;;  %v546_v3 = vpop.xlane.xlu0 %545  ;;  %v631_v5 = vsel %vm519_vm3, %v605_v52, 0.0 }
 0x266   :  { %v576_v6 = vmul.f32 0.030303031, %v546_v3  ;;  %632 = vadd.xlane.f32.xlu1 %v631_v5  ;;  %v549_v7 = vpop.xlane.xlu1 %548  ;;  %v606_v60 = vmul.f32 %v1565_v61, %v1565_v61 }
 0x267   :  { %v577_v8 = vmul.f32 0.030303031, %v549_v7  ;;  %v607_v58 = vmul.f32 %v1571_v1, %v1571_v1 }
 0x268   :  { %v1577_v9 = vsub.f32 %v1489_v62, %v576_v6  ;;  %v634_v21 = vsel %vm519_vm3, %v606_v60, 0.0 }
 0x269   :  { %v1583_v11 = vsub.f32 %v1493_v0, %v577_v8  ;;  %629 = vadd.xlane.f32.xlu0 %v628_v10  ;;  %v564_v14 = vpop.xlane.xlu0 %563  ;;  %v637_v15 = vsel %vm519_vm3, %v607_v58, 0.0 }
 0x26a   :  { %v582_v16 = vmul.f32 0.030303031, %v564_v14  ;;  %638 = vadd.xlane.f32.xlu1 %v637_v15  ;;  %v567_v17 = vpop.xlane.xlu1 %566  ;;  %v608_v0 = vmul.f32 %v1577_v9, %v1577_v9 }
 0x26b   :  { %v583_v18 = vmul.f32 0.030303031, %v567_v17  ;;  %v609_v62 = vmul.f32 %v1583_v11, %v1583_v11 }
 0x26c   :  { %v1589_v20 = vsub.f32 %v1497_v2, %v582_v16  ;;  %v640_v26 = vsel %vm519_vm3, %v608_v0, 0.0 }
 0x26d   :  { %v1595_v23 = vsub.f32 %v1501_v4, %v583_v18  ;;  %635 = vadd.xlane.f32.xlu0 %v634_v21  ;;  %v643_v24 = vsel %vm519_vm3, %v609_v62, 0.0  ;;  %v1342_v4 = vmov 32   ;;  %v1612_v21 = vld [vmem:[%s1910_s4 + $0x2] ss:$0 sm:$0xff] }
 0x26e   :  { %644 = vadd.xlane.f32.xlu1 %v643_v24  ;;  %v614_v2 = vmul.f32 %v1589_v20, %v1589_v20  ;;  %1241 = vset.pattern.permute.xlu0 %v1342_v4 }
 0x26f   :  { %v615_v25 = vmul.f32 %v1595_v23, %v1595_v23  ;;  %1240 = vset.pattern.permute.xlu1 %v1342_v4 }
 0x270   :  { %v658_v29 = vsel %vm519_vm3, %v614_v2, 0.0 }
 0x271   :  { %641 = vadd.xlane.f32.xlu0 %v640_v26  ;;  %v661_v27 = vsel %vm519_vm3, %v615_v25, 0.0 }
 0x272   :  { %662 = vadd.xlane.f32.xlu1 %v661_v27 }
 0x275   :  { %659 = vadd.xlane.f32.xlu0 %v658_v29 }
 0x2e2   :  { %v621_v30 = vpop.xlane.xlu1 %620 }
 0x2e3   :  { %v665_v31 = vmul.f32 0.030303031, %v621_v30 }
 0x2e5   :  { %v681_v35 = vadd.f32 1e-05, %v665_v31  ;;  %v1621_v31 = vld [vmem:[%s1910_s4 + $0x3] ss:$0 sm:$0xff]  ;;  %s1343_s4 = smov 96  }
 0x2e6   :  { %v651_v33 = vpop.xlane.xlu1 %650  ;;  %v618_v34 = vpop.xlane.xlu0 %617 }
 0x2e7   :  { %v664_v36 = vmul.f32 0.030303031, %v618_v34  ;;  %1242 = vrsqrt.f32 %v681_v35  ;;  %v675_v45 = vmul.f32 0.030303031, %v651_v33 }
 0x2e9   :  { %v680_v43 = vadd.f32 1e-05, %v664_v36  ;;  %v691_v55 = vadd.f32 1e-05, %v675_v45 }
 0x2ea   :  { %v627_v37 = vpop.xlane.xlu1 %626  ;;  %v648_v39 = vpop.xlane.xlu0 %647 }
 0x2eb   :  { %v667_v41 = vmul.f32 0.030303031, %v627_v37  ;;  %v674_v24 = vmul.f32 0.030303031, %v648_v39 }
 0x2ed   :  { %v683_v40 = vadd.f32 1e-05, %v667_v41 }
 0x2ee   :  { %v624_v44 = vpop.xlane.xlu0 %623 }
 0x2ef   :  { %1244 = vrsqrt.f32 %v683_v40  ;;  %v666_v47 = vmul.f32 0.030303031, %v624_v44  ;;  %v657_v46 = vpop.xlane.xlu1 %656 }
 0x2f0   :  { %1246 = vrsqrt.f32 %v680_v43  ;;  %v677_v51 = vmul.f32 0.030303031, %v657_v46 }
 0x2f1   :  { %v682_v50 = vadd.f32 1e-05, %v666_v47  ;;  %v1243_v5 = vpop.eup %1242 }
 0x2f2   :  { %v1605_v53 = vpop.xlane.xlu0 %653  ;;  %v693_v59 = vadd.f32 1e-05, %v677_v51  ;;  %v713_v17 = vmul.f32 %v1243_v5, %v1510_v12 }
 0x2f3   :  { %1248 = vrsqrt.f32 %v682_v50  ;;  %v633_v56 = vpop.xlane.xlu1 %632 }
 0x2f4   :  { %v669_v57 = vmul.f32 0.030303031, %v633_v56  ;;  %1250 = vrsqrt.f32 %v691_v55  ;;  %v733_v27 = vmul.f32 %v1612_v21, %v713_v17 }
 0x2f6   :  { %v685_v52 = vadd.f32 1e-05, %v669_v57  ;;  %v630_v63 = vpop.xlane.xlu0 %629  ;;  %v1629_v41 = vadd.f32 %v1621_v31, %v733_v27 }
 0x2f7   :  { %v668_v54 = vmul.f32 0.030303031, %v630_v63  ;;  %v639_v3 = vpop.xlane.xlu1 %638 }
 0x2f8   :  { %1252 = vrsqrt.f32 %v685_v52  ;;  %v671_v6 = vmul.f32 0.030303031, %v639_v3 }
 0x2f9   :  { %v1245_v7 = vpop.eup %1244  ;;  %v684_v8 = vadd.f32 1e-05, %v668_v54  ;;  %1254 = vrsqrt.f32 %v693_v59  ;;  %v676_v59 = vmul.f32 0.030303031, %v1605_v53 }
 0x2fa   :  { %v687_v58 = vadd.f32 1e-05, %v671_v6  ;;  %v636_v10 = vpop.xlane.xlu0 %635  ;;  %v715_v60 = vmul.f32 %v1245_v7, %v1524_v22  ;;  %v1247_v16 = vpop.eup %1246 }
 0x2fb   :  { %1256 = vrsqrt.f32 %v684_v8  ;;  %v670_v14 = vmul.f32 0.030303031, %v636_v10  ;;  %v645_v15 = vpop.xlane.xlu1 %644  ;;  %v712_v12 = vmul.f32 %v1247_v16, %v1518_v19 }
 0x2fc   :  { %1258 = vrsqrt.f32 %v687_v58  ;;  %v673_v18 = vmul.f32 0.030303031, %v645_v15  ;;  %v735_v22 = vmul.f32 %v1612_v21, %v715_v60 }
 0x2fd   :  { %v1249_v62 = vpop.eup %1248  ;;  %v686_v0 = vadd.f32 1e-05, %v670_v14  ;;  %v732_v40 = vmul.f32 %v1612_v21, %v712_v12 }
 0x2fe   :  { %v714_v25 = vmul.f32 %v1249_v62, %v1536_v32  ;;  %v689_v26 = vadd.f32 1e-05, %v673_v18  ;;  %v642_v29 = vpop.xlane.xlu0 %641  ;;  %v1251_v30 = vpop.eup %1250  ;;  %v690_v32 = vadd.f32 1e-05, %v674_v24  ;;  %v1625_v36 = vadd.f32 %v1621_v31, %v735_v22 }
 0x2ff   :  { %1260 = vrsqrt.f32 %v686_v0  ;;  %v663_v2 = vpop.xlane.xlu1 %662  ;;  %v672_v19 = vmul.f32 0.030303031, %v642_v29  ;;  %v723_v44 = vmul.f32 %v1251_v30, %v1513_v13  ;;  %v776_v13 = vsel %vm768_vm4, %v1629_v41, -inf }
 0x300   :  { %1262 = vrsqrt.f32 %v689_v26  ;;  %v679_v4 = vmul.f32 0.030303031, %v663_v2  ;;  %v734_v34 = vmul.f32 %v1612_v21, %v714_v25  ;;  %v777_v50 = vsel %vm768_vm4, %v1625_v36, -inf }
 0x301   :  { %v688_v56 = vadd.f32 1e-05, %v672_v19  ;;  %v1647_v57 = vadd.f32 %v1621_v31, %v732_v40  ;;  %v743_v54 = vmul.f32 %v1612_v21, %v723_v44  ;;  %v778_v7 = vmax.f32 %v776_v13, %v777_v50 }
 0x302   :  { %v1253_v33 = vpop.eup %1252  ;;  %v695_v35 = vadd.f32 1e-05, %v679_v4  ;;  %v1635_v46 = vadd.f32 %v1621_v31, %v734_v34  ;;  %v692_v62 = vadd.f32 1e-05, %v676_v59 }
 0x303   :  { %v717_v37 = vmul.f32 %v1253_v33, %v1559_v48  ;;  %v1255_v39 = vpop.eup %1254  ;;  %v769_v14 = vsel %vm768_vm4, %v1647_v57, -inf }
 0x304   :  { %1264 = vrsqrt.f32 %v695_v35  ;;  %v725_v3 = vmul.f32 %v1255_v39, %v1548_v42  ;;  %v770_v8 = vsel %vm768_vm4, %v1635_v46, -inf }
 0x305   :  { %v1257_v43 = vpop.eup %1256  ;;  %v737_v45 = vmul.f32 %v1612_v21, %v717_v37  ;;  %1266 = vrsqrt.f32 %v690_v32  ;;  %v771_v18 = vmax.f32 %v769_v14, %v770_v8 }
 0x306   :  { %v1259_v47 = vpop.eup %1258  ;;  %v716_v48 = vmul.f32 %v1257_v43, %v1553_v49  ;;  %v660_v49 = vpop.xlane.xlu0 %659  ;;  %1268 = vrsqrt.f32 %v688_v56  ;;  %v745_v25 = vmul.f32 %v1612_v21, %v725_v3 }
 0x307   :  { %v1641_v51 = vadd.f32 %v1621_v31, %v737_v45  ;;  %v719_v55 = vmul.f32 %v1259_v47, %v1571_v1  ;;  %v678_v60 = vmul.f32 0.030303031, %v660_v49  ;;  %1270 = vrsqrt.f32 %v692_v62 }
 0x308   :  { %v736_v52 = vmul.f32 %v1612_v21, %v716_v48  ;;  %v1694_v19 = vadd.f32 %v1621_v31, %v745_v25 }
 0x309   :  { %v1261_v63 = vpop.eup %1260  ;;  %v779_v1 = vsel %vm768_vm4, %v1641_v51, -inf  ;;  %v739_v5 = vmul.f32 %v1612_v21, %v719_v55  ;;  %v694_v29 = vadd.f32 1e-05, %v678_v60 }
 0x30a   :  { %v1263_v6 = vpop.eup %1262  ;;  %v1659_v53 = vadd.f32 %v1621_v31, %v736_v52  ;;  %v718_v58 = vmul.f32 %v1261_v63, %v1565_v61  ;;  %v780_v15 = vmax.f32 %v778_v7, %v779_v1  ;;  %v793_v47 = vsel %vm768_vm4, %v1694_v19, -inf }
 0x30b   :  { %v1663_v10 = vadd.f32 %v1621_v31, %v739_v5  ;;  %v721_v42 = vmul.f32 %v1263_v6, %v1583_v11  ;;  %v1675_v11 = vadd.f32 %v1621_v31, %v743_v54  ;;  %1272 = vrsqrt.f32 %v694_v29 }
 0x30c   :  { %v772_v16 = vsel %vm768_vm4, %v1659_v53, -inf  ;;  %v738_v17 = vmul.f32 %v1612_v21, %v718_v58 }
 0x30d   :  { %v781_v61 = vsel %vm768_vm4, %v1663_v10, -inf  ;;  %v741_v0 = vmul.f32 %v1612_v21, %v721_v42  ;;  %v773_v2 = vmax.f32 %v771_v18, %v772_v16  ;;  %v791_v37 = vsel %vm768_vm4, %v1675_v11, -inf }
 0x30e   :  { %v1265_v24 = vpop.eup %1264  ;;  %v782_v26 = vmax.f32 %v780_v15, %v781_v61  ;;  %v1679_v22 = vadd.f32 %v1621_v31, %v738_v17 }
 0x30f   :  { %v1682_v27 = vadd.f32 %v1621_v31, %v741_v0  ;;  %v727_v12 = vmul.f32 %v1265_v24, %v1595_v23  ;;  %v1267_v4 = vpop.eup %1266 }
 0x310   :  { %v800_v30 = vsub.f32 %v1625_v36, %v782_v26  ;;  %v774_v33 = vsel %vm768_vm4, %v1679_v22, -inf  ;;  %v802_v23 = vsub.f32 %v1641_v51, %v782_v26  ;;  %v1269_v45 = vpop.eup %1268  ;;  %v804_v48 = vsub.f32 %v1663_v10, %v782_v26 }
 0x311   :  { %v775_v32 = vmax.f32 %v773_v2, %v774_v33  ;;  %v790_v34 = vsel %vm768_vm4, %v1682_v27, -inf  ;;  %v747_v35 = vmul.f32 %v1612_v21, %v727_v12  ;;  %v798_v13 = vsub.f32 %v1629_v41, %v782_v26  ;;  %v1271_v5 = vpop.eup %1270 }
 0x312   :  { %v792_v40 = vmax.f32 %v790_v34, %v791_v37  ;;  %v819_v43 = vmul.f32 1.442695, %v800_v30  ;;  %v823_v50 = vmul.f32 1.442695, %v802_v23  ;;  %v720_v59 = vmul.f32 %v1269_v45, %v1577_v9 }
 0x313   :  { %v797_v39 = vsub.f32 %v1647_v57, %v775_v32  ;;  %v1699_v44 = vadd.f32 %v1621_v31, %v747_v35  ;;  %v799_v49 = vsub.f32 %v1635_v46, %v775_v32  ;;  %v722_v63 = vmul.f32 %v1267_v4, %v1529_v28 }
 0x314   :  { %v794_v56 = vmax.f32 %v792_v40, %v793_v47  ;;  %1274 = vpow2.f32 %v819_v43  ;;  %v827_v54 = vmul.f32 1.442695, %v804_v48  ;;  %v801_v3 = vsub.f32 %v1659_v53, %v775_v32 }
 0x315   :  { %v813_v55 = vmul.f32 1.442695, %v797_v39  ;;  %v795_v52 = vsel %vm768_vm4, %v1699_v44, -inf  ;;  %1276 = vpow2.f32 %v823_v50  ;;  %v815_v1 = vmul.f32 1.442695, %v798_v13  ;;  %v1273_v9 = vpop.eup %1272 }
 0x316   :  { %v796_v6 = vmax.f32 %v794_v56, %v795_v52  ;;  %v740_v7 = vmul.f32 %v1612_v21, %v720_v59  ;;  %v817_v8 = vmul.f32 1.442695, %v799_v49  ;;  %v742_v58 = vmul.f32 %v1612_v21, %v722_v63 }
 0x317   :  { %1278 = vpow2.f32 %v813_v55  ;;  %v724_v42 = vmul.f32 %v1271_v5, %v1541_v38  ;;  %v803_v28 = vsub.f32 %v1679_v22, %v775_v32  ;;  %v821_v60 = vmul.f32 1.442695, %v801_v3 }
 0x318   :  { %1280 = vpow2.f32 %v815_v1  ;;  %v806_v14 = vsub.f32 %v1682_v27, %v796_v6  ;;  %v1717_v15 = vadd.f32 %v1621_v31, %v740_v7  ;;  %v726_v16 = vmul.f32 %v1273_v9, %v1589_v20 }
 0x319   :  { %1282 = vpow2.f32 %v827_v54  ;;  %v808_v17 = vsub.f32 %v1675_v11, %v796_v6  ;;  %v1724_v62 = vadd.f32 %v1621_v31, %v742_v58  ;;  %v744_v38 = vmul.f32 %v1612_v21, %v724_v42 }
 0x31a   :  { %1284 = vpow2.f32 %v817_v8  ;;  %v825_v61 = vmul.f32 1.442695, %v803_v28  ;;  %v831_v0 = vmul.f32 1.442695, %v806_v14  ;;  %v783_v25 = vsel %vm768_vm4, %v1717_v15, -inf }
 0x31b   :  { %1286 = vpow2.f32 %v821_v60  ;;  %v746_v20 = vmul.f32 %v1612_v21, %v726_v16  ;;  %v835_v26 = vmul.f32 1.442695, %v808_v17  ;;  %v810_v12 = vsub.f32 %v1694_v19, %v796_v6 }
 0x31c   :  { %v784_v30 = vsel %vm768_vm4, %v1724_v62, -inf  ;;  %v1740_v33 = vadd.f32 %v1621_v31, %v744_v38  ;;  %1288 = vpow2.f32 %v825_v61  ;;  %v812_v47 = vsub.f32 %v1699_v44, %v796_v6 }
 0x31d   :  { %v785_v32 = vmax.f32 %v783_v25, %v784_v30  ;;  %1290 = vpow2.f32 %v831_v0  ;;  %v1744_v35 = vadd.f32 %v1621_v31, %v746_v20  ;;  %v839_v23 = vmul.f32 1.442695, %v810_v12 }
 0x31e   :  { %v1721_v18 = vpop.eup %1274  ;;  %1292 = vpow2.f32 %v835_v26  ;;  %v786_v45 = vsel %vm768_vm4, %v1740_v33, -inf  ;;  %v843_v49 = vmul.f32 1.442695, %v812_v47 }
 0x31f   :  { %v1727_v24 = vpop.eup %1276  ;;  %v853_v29 = vsel %vm768_vm4, %v1721_v18, 0.0  ;;  %v787_v50 = vmax.f32 %v785_v32, %v786_v45  ;;  %v788_v13 = vsel %vm768_vm4, %v1744_v35, -inf  ;;  %1294 = vpow2.f32 %v839_v23 }
 0x320   :  { %v855_v39 = vsel %vm768_vm4, %v1727_v24, 0.0 }
 0x321   :  { %v1732_v2 = vpop.eup %1278  ;;  %v789_v63 = vmax.f32 %v787_v50, %v788_v13 }
 0x322   :  { %v1281_v4 = vpop.eup %1280  ;;  %v845_v40 = vsel %vm768_vm4, %v1732_v2, 0.0 }
 0x323   :  { %v852_v21 = vsel %vm768_vm4, %v1281_v4, 0.0  ;;  %v1283_v34 = vpop.eup %1282  ;;  %v807_v7 = vsub.f32 %v1724_v62, %v789_v63  ;;  %v805_v58 = vsub.f32 %v1717_v15, %v789_v63  ;;  %v809_v25 = vsub.f32 %v1740_v33, %v789_v63 }
 0x324   :  { %v854_v37 = vadd.f32 %v853_v29, %v852_v21  ;;  %v1285_v43 = vpop.eup %1284  ;;  %v857_v31 = vsel %vm768_vm4, %v1283_v34, 0.0  ;;  %v811_v30 = vsub.f32 %v1744_v35, %v789_v63 }
 0x325   :  { %v846_v55 = vsel %vm768_vm4, %v1285_v43, 0.0  ;;  %v1287_v56 = vpop.eup %1286  ;;  %v833_v14 = vmul.f32 1.442695, %v807_v7  ;;  %v829_v38 = vmul.f32 1.442695, %v805_v58 }
 0x326   :  { %v856_v48 = vadd.f32 %v855_v39, %v854_v37  ;;  %v847_v52 = vadd.f32 %v846_v55, %v845_v40  ;;  %v848_v54 = vsel %vm768_vm4, %v1287_v56, 0.0  ;;  %v1289_v3 = vpop.eup %1288  ;;  %v837_v32 = vmul.f32 1.442695, %v809_v25 }
 0x327   :  { %v1758_v5 = vpop.eup %1290  ;;  %v850_v8 = vsel %vm768_vm4, %v1289_v3, 0.0  ;;  %v841_v23 = vmul.f32 1.442695, %v811_v30 }
 0x328   :  { %v858_v59 = vadd.f32 %v857_v31, %v856_v48  ;;  %v849_v1 = vadd.f32 %v848_v54, %v847_v52  ;;  %v1293_v6 = vpop.eup %1292  ;;  %v866_v42 = vsel %vm768_vm4, %v1758_v5, 0.0 }
 0x329   :  { %v867_v28 = vsel %vm768_vm4, %v1293_v6, 0.0  ;;  %v1295_v60 = vpop.eup %1294 }
 0x32a   :  { %1296 = vrcp.f32 %v858_v59  ;;  %v851_v9 = vadd.f32 %v850_v8, %v849_v1  ;;  %v868_v17 = vadd.f32 %v867_v28, %v866_v42  ;;  %v869_v20 = vsel %vm768_vm4, %v1295_v60, 0.0 }
 0x32b   :  { %1298 = vpow2.f32 %v843_v49 }
 0x32c   :  { %1300 = vrcp.f32 %v851_v9  ;;  %v870_v12 = vadd.f32 %v869_v20, %v868_v17 }
 0x32d   :  { %1302 = vpow2.f32 %v833_v14 }
 0x32e   :  { %1304 = vpow2.f32 %v829_v38 }
 0x32f   :  { %1306 = vpow2.f32 %v837_v32 }
 0x334   :  { %v1297_v16 = vpop.eup %1296 }
 0x335   :  { %v878_v61 = vmul.f32 %v1297_v16, %v1281_v4  ;;  %v884_v0 = vmul.f32 %v1297_v16, %v1283_v34  ;;  %v1299_v26 = vpop.eup %1298  ;;  %v880_v29 = vmul.f32 %v1297_v16, %v1721_v18  ;;  %v882_v34 = vmul.f32 %v1297_v16, %v1727_v24 }
 0x336   :  { %v871_v4 = vsel %vm768_vm4, %v1299_v26, 0.0  ;;  %v1301_v37 = vpop.eup %1300 }
 0x337   :  { %900 = vperm.xlu1 %1240, %v878_v61   ;;  %930 = vperm.xlu0 %1241, %v884_v0   ;;  %v872_v21 = vadd.f32 %v871_v4, %v870_v12  ;;  %v1303_v18 = vpop.eup %1302  ;;  %v879_v39 = vmul.f32 %v1301_v37, %v1285_v43  ;;  %v881_v45 = vmul.f32 %v1301_v37, %v1287_v56 }
 0x338   :  { %v1305_v40 = vpop.eup %1304  ;;  %v860_v48 = vsel %vm768_vm4, %v1303_v18, 0.0  ;;  %v883_v31 = vmul.f32 %v1301_v37, %v1289_v3  ;;  %v877_v55 = vmul.f32 %v1301_v37, %v1732_v2 }
 0x339   :  { %1308 = vrcp.f32 %v872_v21  ;;  %v859_v47 = vsel %vm768_vm4, %v1305_v40, 0.0  ;;  %v1307_v24 = vpop.eup %1306 }
 0x33a   :  { %1310 = vpow2.f32 %v841_v23  ;;  %v861_v50 = vadd.f32 %v860_v48, %v859_v47  ;;  %v862_v43 = vsel %vm768_vm4, %v1307_v24, 0.0 }
 0x33b   :  { %910 = vperm.xlu1 %1240, %v880_v29   ;;  %1023 = vrot.lane.b32.xlu0 %v878_v61, %s1343_s4 }
 0x33c   :  { %v863_v52 = vadd.f32 %v862_v43, %v861_v50 }
 0x33f   :  { %920 = vperm.xlu1 %1240, %v882_v34   ;;  %1027 = vrot.lane.b32.xlu0 %v880_v29, %s1343_s4 }
 0x343   :  { %1031 = vrot.lane.b32.xlu0 %v882_v34, %s1343_s4  ;;  %905 = vperm.xlu1 %1240, %v879_v39   ;;  %v1309_v13 = vpop.eup %1308 }
 0x344   :  { %v1311_v59 = vpop.eup %1310  ;;  %v888_v56 = vmul.f32 %v1309_v13, %v1293_v6  ;;  %v890_v54 = vmul.f32 %v1309_v13, %v1295_v60  ;;  %v892_v2 = vmul.f32 %v1309_v13, %v1299_v26  ;;  %v886_v3 = vmul.f32 %v1309_v13, %v1758_v5 }
 0x345   :  { %v864_v49 = vsel %vm768_vm4, %v1311_v59, 0.0 }
 0x346   :  { %v865_v63 = vadd.f32 %v864_v49, %v863_v52 }
 0x347   :  { %1035 = vrot.lane.b32.xlu0 %v884_v0, %s1343_s4  ;;  %915 = vperm.xlu1 %1240, %v881_v45  }
 0x348   :  { %1312 = vrcp.f32 %v865_v63 }
 0x34b   :  { %925 = vperm.xlu1 %1240, %v883_v31   ;;  %895 = vperm.xlu0 %1241, %v877_v55  }
 0x34f   :  { %1021 = vrot.lane.b32.xlu1 %v877_v55, %s1343_s4  ;;  %950 = vperm.xlu0 %1241, %v888_v56  }
 0x352   :  { %v1313_v1 = vpop.eup %1312 }
 0x353   :  { %1025 = vrot.lane.b32.xlu1 %v879_v39, %s1343_s4  ;;  %960 = vperm.xlu0 %1241, %v890_v54   ;;  %v885_v6 = vmul.f32 %v1313_v1, %v1305_v40  ;;  %v887_v7 = vmul.f32 %v1313_v1, %v1303_v18  ;;  %v889_v8 = vmul.f32 %v1313_v1, %v1307_v24 }
 0x354   :  { %v891_v9 = vmul.f32 %v1313_v1, %v1311_v59 }
 0x357   :  { %1029 = vrot.lane.b32.xlu1 %v881_v45, %s1343_s4  ;;  %970 = vperm.xlu0 %1241, %v892_v2  }
 0x35b   :  { %1033 = vrot.lane.b32.xlu1 %v883_v31, %s1343_s4  ;;  %1039 = vrot.lane.b32.xlu0 %v886_v3, %s1343_s4 }
 0x35f   :  { %940 = vperm.xlu1 %1240, %v886_v3   ;;  %1043 = vrot.lane.b32.xlu0 %v888_v56, %s1343_s4 }
 0x363   :  { %1047 = vrot.lane.b32.xlu0 %v890_v54, %s1343_s4  ;;  %935 = vperm.xlu1 %1240, %v885_v6  }
 0x367   :  { %1051 = vrot.lane.b32.xlu0 %v892_v2, %s1343_s4  ;;  %945 = vperm.xlu1 %1240, %v887_v7  }
 0x36b   :  { %955 = vperm.xlu1 %1240, %v889_v8  }
 0x36f   :  { %965 = vperm.xlu1 %1240, %v891_v9  }
 0x373   :  { %1037 = vrot.lane.b32.xlu1 %v885_v6, %s1343_s4 }
 0x377   :  { %1041 = vrot.lane.b32.xlu1 %v887_v7, %s1343_s4 }
 0x37b   :  { %1045 = vrot.lane.b32.xlu1 %v889_v8, %s1343_s4 }
 0x37f   :  { %1049 = vrot.lane.b32.xlu1 %v891_v9, %s1343_s4  ;;  %s1314_s4 = scalar_lea.vmem %s1092_s24, 512 }
 0x380   :  { %p1315_p0 = scmp.ne.s32.totalorder %s1092_s24, %s1314_s4  ;;  %p1320_p2 = scmp.lt.s32.totalorder %s1314_s4, %s1314_s4 }
 0x382   :  { %p1321_p3 = por %p1320_p2, %p1319_p1 }
 0x384   :  { %p1322_p4 = pnand %p1321_p3, %p1315_p0 }
 0x3b6   :  { %v901_v5 = vpop.permute.xlu1 %900  ;;  %v931_v58 = vpop.permute.xlu0 %930 }
 0x3b7   :  { %v974_v60 = vmul.f32 %v901_v5, %v1629_v41  ;;  %v980_v0 = vmul.f32 %v931_v58, %v1663_v10 }
 0x3b9   :  { %v996_v61 = vsel %vm114_vm1, %v974_v60, 0.0  ;;  %v1001_v29 = vsel %vm114_vm1, %v980_v0, 0.0 }
 0x3ba   :  { %v911_v42 = vpop.permute.xlu1 %910  ;;  %v1024_v28 = vpop.permute.xlu0 %1023 }
 0x3bb   :  { %v976_v14 = vmul.f32 %v911_v42, %v1625_v36  ;;  %1071 = vst.msk [vmem:[%s1912_s6 + $0x8] sm:$0xff] %vm1069_vm5, %v1024_v28 }
 0x3bd   :  { %v997_v16 = vsel %vm114_vm1, %v976_v14, 0.0 }
 0x3be   :  { %v921_v17 = vpop.permute.xlu1 %920  ;;  %v1028_v38 = vpop.permute.xlu0 %1027  ;;  %v998_v36 = vadd.f32 %v997_v16, %v996_v61 }
 0x3bf   :  { %v978_v25 = vmul.f32 %v921_v17, %v1641_v51  ;;  %1073 = vst.msk [vmem:[%s1912_s6 + $0x18] sm:$0xff] %vm1069_vm5, %v1028_v38 }
 0x3c1   :  { %v999_v41 = vsel %vm114_vm1, %v978_v25, 0.0 }
 0x3c2   :  { %v1000_v20 = vadd.f32 %v999_v41, %v998_v36  ;;  %v906_v26 = vpop.permute.xlu1 %905  ;;  %v1032_v12 = vpop.permute.xlu0 %1031 }
 0x3c3   :  { %1075 = vst.msk [vmem:[%s1912_s6 + $0x28] sm:$0xff] %vm1069_vm5, %v1032_v12  ;;  %v975_v32 = vmul.f32 %v906_v26, %v1635_v46 }
 0x3c4   :  { %v1002_v10 = vadd.f32 %v1001_v29, %v1000_v20 }
 0x3c5   :  { %v990_v23 = vsel %vm114_vm1, %v975_v32, 0.0 }
 0x3c6   :  { %1018 = vst.msk [vmem:[#allocation2 + $0x8] sm:$0xff] %vm114_vm1, %v1002_v10  ;;  %v916_v51 = vpop.permute.xlu1 %915  ;;  %v1036_v30 = vpop.permute.xlu0 %1035 }
 0x3c7   :  { %1077 = vst.msk [vmem:[%s1912_s6 + $0x38] sm:$0xff] %vm1069_vm5, %v1036_v30  ;;  %v977_v34 = vmul.f32 %v916_v51, %v1659_v53 }
 0x3c9   :  { %v992_v48 = vsel %vm114_vm1, %v977_v34, 0.0 }
 0x3ca   :  { %v926_v4 = vpop.permute.xlu1 %925  ;;  %v896_v21 = vpop.permute.xlu0 %895 }
 0x3cb   :  { %v973_v37 = vmul.f32 %v896_v21, %v1647_v57  ;;  %v979_v18 = vmul.f32 %v926_v4, %v1679_v22 }
 0x3cd   :  { %v989_v39 = vsel %vm114_vm1, %v973_v37, 0.0  ;;  %v994_v53 = vsel %vm114_vm1, %v979_v18, 0.0 }
 0x3ce   :  { %v991_v40 = vadd.f32 %v990_v23, %v989_v39  ;;  %v1022_v45 = vpop.permute.xlu1 %1021  ;;  %v951_v47 = vpop.permute.xlu0 %950 }
 0x3cf   :  { %1070 = vst.msk [vmem:[%s1912_s6] sm:$0xff] %vm1069_vm5, %v1022_v45  ;;  %v984_v43 = vmul.f32 %v951_v47, %v1675_v11 }
 0x3d0   :  { %v993_v46 = vadd.f32 %v992_v48, %v991_v40 }
 0x3d1   :  { %v1011_v63 = vsel %vm114_vm1, %v984_v43, 0.0 }
 0x3d2   :  { %v995_v57 = vadd.f32 %v994_v53, %v993_v46  ;;  %v1026_v24 = vpop.permute.xlu1 %1025  ;;  %v961_v50 = vpop.permute.xlu0 %960 }
 0x3d3   :  { %1072 = vst.msk [vmem:[%s1912_s6 + $0x10] sm:$0xff] %vm1069_vm5, %v1026_v24  ;;  %v986_v56 = vmul.f32 %v961_v50, %v1694_v19 }
 0x3d4   :  { %1017 = vst.msk [vmem:[#allocation2] sm:$0xff] %vm114_vm1, %v995_v57 }
 0x3d5   :  { %v1013_v6 = vsel %vm114_vm1, %v986_v56, 0.0 }
 0x3d6   :  { %v1030_v22 = vpop.permute.xlu1 %1029  ;;  %v971_v31 = vpop.permute.xlu0 %970 }
 0x3d7   :  { %1074 = vst.msk [vmem:[%s1912_s6 + $0x20] sm:$0xff] %vm1069_vm5, %v1030_v22  ;;  %v988_v54 = vmul.f32 %v971_v31, %v1699_v44 }
 0x3d9   :  { %v1015_v19 = vsel %vm114_vm1, %v988_v54, 0.0 }
 0x3da   :  { %v1034_v55 = vpop.permute.xlu1 %1033  ;;  %v1040_v13 = vpop.permute.xlu0 %1039 }
 0x3db   :  { %1076 = vst.msk [vmem:[%s1912_s6 + $0x30] sm:$0xff] %vm1069_vm5, %v1034_v55  ;;  %1079 = vst.msk [vmem:[%s1912_s6 + $0x48] sm:$0xff] %vm1069_vm5, %v1040_v13 }
 0x3de   :  { %v941_v59 = vpop.permute.xlu1 %940  ;;  %v1044_v52 = vpop.permute.xlu0 %1043 }
 0x3df   :  { %v982_v49 = vmul.f32 %v941_v59, %v1682_v27  ;;  %1081 = vst.msk [vmem:[%s1912_s6 + $0x58] sm:$0xff] %vm1069_vm5, %v1044_v52 }
 0x3e1   :  { %v1010_v2 = vsel %vm114_vm1, %v982_v49, 0.0 }
 0x3e2   :  { %v1012_v3 = vadd.f32 %v1011_v63, %v1010_v2  ;;  %v936_v1 = vpop.permute.xlu1 %935  ;;  %v1048_v11 = vpop.permute.xlu0 %1047 }
 0x3e3   :  { %1083 = vst.msk [vmem:[%s1912_s6 + $0x68] sm:$0xff] %vm1069_vm5, %v1048_v11  ;;  %v981_v5 = vmul.f32 %v936_v1, %v1717_v15 }
 0x3e4   :  { %v1014_v27 = vadd.f32 %v1013_v6, %v1012_v3 }
 0x3e5   :  { %v1003_v60 = vsel %vm114_vm1, %v981_v5, 0.0 }
 0x3e6   :  { %v1016_v7 = vadd.f32 %v1015_v19, %v1014_v27  ;;  %v946_v8 = vpop.permute.xlu1 %945  ;;  %v1052_v9 = vpop.permute.xlu0 %1051 }
 0x3e7   :  { %v983_v44 = vmul.f32 %v946_v8, %v1724_v62  ;;  %1085 = vst.msk [vmem:[%s1912_s6 + $0x78] sm:$0xff] %vm1069_vm5, %v1052_v9 }
 0x3e8   :  { %1020 = vst.msk [vmem:[#allocation2 + $0x18] sm:$0xff] %vm114_vm1, %v1016_v7 }
 0x3e9   :  { %v1004_v42 = vsel %vm114_vm1, %v983_v44, 0.0 }
 0x3ea   :  { %v956_v58 = vpop.permute.xlu1 %955  ;;  %v1005_v16 = vadd.f32 %v1004_v42, %v1003_v60 }
 0x3eb   :  { %v985_v28 = vmul.f32 %v956_v58, %v1740_v33 }
 0x3ed   :  { %v1006_v14 = vsel %vm114_vm1, %v985_v28, 0.0 }
 0x3ee   :  { %v966_v62 = vpop.permute.xlu1 %965  ;;  %v1007_v38 = vadd.f32 %v1006_v14, %v1005_v16 }
 0x3ef   :  { %v987_v17 = vmul.f32 %v966_v62, %v1744_v35 }
 0x3f1   :  { %v1008_v61 = vsel %vm114_vm1, %v987_v17, 0.0 }
 0x3f2   :  { %v1009_v0 = vadd.f32 %v1008_v61, %v1007_v38  ;;  %v1038_v15 = vpop.permute.xlu1 %1037 }
 0x3f3   :  { %1078 = vst.msk [vmem:[%s1912_s6 + $0x40] sm:$0xff] %vm1069_vm5, %v1038_v15 }
 0x3f4   :  { %1019 = vst.msk [vmem:[#allocation2 + $0x10] sm:$0xff] %vm114_vm1, %v1009_v0 }
 0x3f5   :  { %1325 = shalt.err (!%p1322_p4)
}
 0x3f6   :  { %s1326_s29 = scalar_lea.hbm %s1911_s5, 512 }
 0x3f7   :  { %p1327_p5 = scmp.ne.s32.totalorder %s1911_s5, %s1326_s29  ;;  %p1330_p6 = scmp.lt.u32.totalorder %s1326_s29, %s1911_s5 }
 0x3f9   :  { %p1332_p7 = pnand %p1330_p6, %p1327_p5 }
 0x3fb   :  { %1335 = shalt.err (!%p1332_p7)
}
 0x3fc   :  { %s1345_s10 = smov 128   ;;  %s1346_s11 = smov 8   ;;  %v1042_v33 = vpop.permute.xlu1 %1041 }
 0x3fd   :  { %1097 = dma.vmem_to_hbm [thread:$0]  %s1092_s24, 512, %s1911_s5, [#allocation3], %s1345_s10, %s1345_s10, %s1346_s11  }
 0x3fe   :  { %1080 = vst.msk [vmem:[%s1912_s6 + $0x50] sm:$0xff] %vm1069_vm5, %v1042_v33 }
 0x400   :  { %v1046_v35 = vpop.permute.xlu1 %1045 }
 0x401   :  { %1082 = vst.msk [vmem:[%s1912_s6 + $0x60] sm:$0xff] %vm1069_vm5, %v1046_v35 }
 0x404   :  { %v1050_v25 = vpop.permute.xlu1 %1049 }
 0x405   :  { %1084 = vst.msk [vmem:[%s1912_s6 + $0x70] sm:$0xff] %vm1069_vm5, %v1050_v25 }
 0x406   :  { %1336 = dma.done.wait [#allocation3], 512  }
 0x407   :  { %1337 = vsyncadd [#allocation3], 4294966784 }
 0x408   :  { %1105 = vsyncpa [#allocation3], 1 }

</bundles_post_ra>
